<compile_context>
chip_gen: v7x
topology: tpu7x:2x2x1
jax: 0.10.0
libtpu: 0.0.40
codegen_flags: <defaults>
</compile_context>

<pallas_src>
import jax
import jax.numpy as jnp
from jax.experimental import pallas as pl
from jax.experimental.pallas import tpu as pltpu


def _round_up(x, m):
    return (x + m - 1) // m * m


def _round_down(x, m):
    return x // m * m


def _tensorcores_per_chip():
    """2 on v7x, 1 on v5e/v6e (and anything we don't recognize)."""
    try:
        kind = jax.devices()[0].device_kind.lower()
    except Exception:
        return 1
    if "v7" in kind or "tpu7" in kind or "7x" in kind:
        return 2
    return 1


def preference_mlp_kernel(x_ref, w1_ref, b1_ref, w2_ref, b2_ref, w3_ref,
                          b3_ref, o_ref):
    # x_ref: (TM, in_dim) f32 tile of the batch.
    x_bf = x_ref[...].astype(jnp.bfloat16)

    # fc1: h1[o, m] = sum_i W1[o, i] * x[m, i]  (contract last dim of both,
    # i.e. W1 @ x^T without an explicit transpose). bf16 MXU, f32 accumulate.
    h1 = jax.lax.dot_general(
        w1_ref[...], x_bf,
        dimension_numbers=(((1,), (1,)), ((), ())),
        preferred_element_type=jnp.float32,
    )                                                      # (hid, TM) f32
    # Fused bias + ReLU + bf16 downcast: the f32 copy is not kept live.
    h1_bf = jnp.maximum(h1 + b1_ref[...], 0.0).astype(jnp.bfloat16)
    # dropout(p=0.2) in eval mode -> identity

    # fc2: W2 @ h1 : (hid, hid) x (hid, TM), bf16 MXU, f32 accumulate.
    h2 = jnp.dot(w2_ref[...], h1_bf,
                 preferred_element_type=jnp.float32)       # (hid, TM) f32
    h2 = jnp.maximum(h2 + b2_ref[...], 0.0)                # f32 (feeds VPU fc3)
    # dropout(p=0.2) in eval mode -> identity

    # fc3: per-batch-lane dot with the w3 column. VPU multiply + sublane
    # reduction keeps the N=1 "matmul" off the MXU and lands the result
    # directly in a lane-dense (1, TM) row.
    out_row = jnp.sum(h2 * w3_ref[...], axis=0, keepdims=True) + b3_ref[0, 0]
    o_ref[...] = out_row.astype(o_ref.dtype)


def _derive_tile(B, in_dim, hid, block_m, n_cores, vmem_budget_bytes):
    """Pick the batch tile (multiple of 128) per generation + VMEM budget."""
    bp128 = _round_up(B, 128)

    # Per-row-of-tm VMEM bytes: x double-buffer (f32) + out double-buffer (f32)
    # + h1/h2 f32 intermediates.
    per_row = 2 * in_dim * 4 + 2 * 4 + 2 * hid * 4
    # Resident (double-buffered) weights/biases: w1, w2 bf16; b1, b2, w3 f32.
    fixed = 2 * (hid * in_dim * 2 + hid * hid * 2 + 3 * hid * 4)
    tm_vmem_max = max(128, _round_down(max(vmem_budget_bytes - fixed, 0)
                                       // max(per_row, 1), 128))

    # Caller cap (rounded DOWN to a multiple of 128, never below 128).
    tm_caller_max = max(128, _round_down(block_m, 128))

    if n_cores >= 2 and bp128 >= 256:
        # v7x: aim for an even number of tiles so both TCs get equal work.
        tm_target = max(128, _round_down(bp128 // 2, 128))
    else:
        # v5e / v6e: one big tile — the grid is just a sequential loop there.
        tm_target = bp128

    tm = min(tm_target, tm_vmem_max, tm_caller_max)
    tm = max(128, _round_down(tm, 128))
    return tm


def preference_model_forward(x, params, *, block_m=4096,
                             vmem_limit_bytes=32 * 1024 * 1024):
    """x: [B, input_dim] float32. params: dict of w1,b1,w2,b2,w3,b3."""
    B, in_dim = x.shape
    hid = params["w2"].shape[0]

    n_cores = _tensorcores_per_chip()
    # Leave headroom inside the declared VMEM limit for the tile derivation.
    tm = _derive_tile(B, in_dim, hid, block_m, n_cores,
                      vmem_budget_bytes=(vmem_limit_bytes * 3) // 4)

    bp = _round_up(B, tm)
    if bp != B:
        x = jnp.pad(x, ((0, bp - B), (0, 0)))
    n_tiles = bp // tm

    w1, b1, w2, b2, w3, b3 = (params["w1"], params["b1"], params["w2"],
                              params["b2"], params["w3"], params["b3"])

    # Cost estimate from the padded batch, including the elementwise epilogue
    # traffic, so the advisory hint matches the real call.
    flops = 2 * bp * (in_dim * hid + hid * hid + hid) + 4 * bp * hid
    bytes_accessed = (bp * in_dim * x.dtype.itemsize
                      + w1.size * w1.dtype.itemsize
                      + w2.size * w2.dtype.itemsize
                      + (b1.size + b2.size + w3.size + b3.size) * 4
                      + 2 * bp * hid * 4      # h1/h2 epilogue passes
                      + bp * 4)               # output

    out = pl.pallas_call(
        preference_mlp_kernel,
        out_shape=jax.ShapeDtypeStruct((1, bp), jnp.float32),
        grid=(n_tiles,),
        in_specs=[
            pl.BlockSpec((tm, in_dim), lambda i: (i, 0)),        # x tile (pipelined)
            pl.BlockSpec((hid, in_dim), lambda i: (0, 0)),       # w1 (VMEM-resident)
            pl.BlockSpec((hid, 1), lambda i: (0, 0)),            # b1 (resident)
            pl.BlockSpec((hid, hid), lambda i: (0, 0)),          # w2 (resident)
            pl.BlockSpec((hid, 1), lambda i: (0, 0)),            # b2 (resident)
            pl.BlockSpec((hid, 1), lambda i: (0, 0)),            # w3 (resident)
            pl.BlockSpec(memory_space=pltpu.MemorySpace.SMEM),   # b3 scalar
        ],
        out_specs=pl.BlockSpec((1, tm), lambda i: (0, i)),       # lane-dense out
        compiler_params=pltpu.CompilerParams(
            dimension_semantics=("parallel",),
            vmem_limit_bytes=vmem_limit_bytes),
        cost_estimate=pl.CostEstimate(
            flops=flops, transcendentals=0, bytes_accessed=bytes_accessed),
    )(x, w1, b1, w2, b2, w3, b3)

    return out[0, :B].reshape(B, 1)


def init_params(key, input_dim, hidden_dim=128):
    """Deterministic synthetic parameters.

    Weights are stored PyTorch-style [out_features, in_features] (bf16 for the
    MXU); biases as f32 columns [out_features, 1]; fc3 weight as a column
    [hidden, 1] used on the VPU in f32. Parity with the PyTorch f32 model is
    bf16-matmul parity, not bit parity.
    """
    k1, k2, k3, k4, k5, k6 = jax.random.split(key, 6)
    s1 = 1.0 / float(input_dim) ** 0.5
    s2 = 1.0 / float(hidden_dim) ** 0.5
    return {
        "w1": jax.random.uniform(k1, (hidden_dim, input_dim), jnp.float32,
                                 -s1, s1).astype(jnp.bfloat16),
        "b1": jax.random.uniform(k2, (hidden_dim, 1), jnp.float32, -s1, s1),
        "w2": jax.random.uniform(k3, (hidden_dim, hidden_dim), jnp.float32,
                                 -s2, s2).astype(jnp.bfloat16),
        "b2": jax.random.uniform(k4, (hidden_dim, 1), jnp.float32, -s2, s2),
        "w3": jax.random.uniform(k5, (hidden_dim, 1), jnp.float32, -s2, s2),
        "b3": jax.random.uniform(k6, (1, 1), jnp.float32, -s2, s2),
    }


def reference_forward(x, params):
    """Pure-JAX reference with the same numerics (bf16 operands, f32 accum)."""
    h1 = jnp.dot(x.astype(jnp.bfloat16), params["w1"].T,
                 preferred_element_type=jnp.float32) + params["b1"].T
    h1 = jnp.maximum(h1, 0.0)
    h2 = jnp.dot(h1.astype(jnp.bfloat16), params["w2"].T,
                 preferred_element_type=jnp.float32) + params["b2"].T
    h2 = jnp.maximum(h2, 0.0)
    return h2 @ params["w3"] + params["b3"]


def reference_forward_f32(x, params):
    """All-f32 reference (weights upcast) for a loose sanity check."""
    w1 = params["w1"].astype(jnp.float32)
    w2 = params["w2"].astype(jnp.float32)
    h1 = jnp.maximum(x @ w1.T + params["b1"].T, 0.0)
    h2 = jnp.maximum(h1 @ w2.T + params["b2"].T, 0.0)
    return h2 @ params["w3"] + params["b3"]


if __name__ == "__main__":
    key = jax.random.PRNGKey(0)
    k_x, k_p = jax.random.split(key)

    # Small shapes consistent with the module: feature vectors -> hidden 128.
    batch, input_dim, hidden_dim = 256, 32, 128
    x = jax.random.normal(k_x, (batch, input_dim), jnp.float32)
    params = init_params(k_p, input_dim, hidden_dim)

    out = preference_model_forward(x, params)
    out = jax.block_until_ready(out)

    assert out.shape == (batch, 1)
    ref = reference_forward(x, params)
    assert jnp.allclose(out, ref, atol=1e-2, rtol=1e-2), \
        "mismatch vs bf16-matched reference"
    ref32 = reference_forward_f32(x, params)
    assert jnp.allclose(out, ref32, atol=1e-1, rtol=1e-1), \
        "mismatch vs f32 reference"

    print("KERNEL_OK")
</pallas_src>

<mosaic_0001>
module attributes {stable_mosaic.version = 11 : i64} {
  func.func @preference_mlp_kernel(%arg0: i32, %arg1: memref<256x32xf32, #tpu.memory_space<vmem>>, %arg2: memref<128x32xbf16, #tpu.memory_space<vmem>>, %arg3: memref<128x1xf32, #tpu.memory_space<vmem>>, %arg4: memref<128x128xbf16, #tpu.memory_space<vmem>>, %arg5: memref<128x1xf32, #tpu.memory_space<vmem>>, %arg6: memref<128x1xf32, #tpu.memory_space<vmem>>, %arg7: memref<1x1xf32, #tpu.memory_space<smem>>, %arg8: memref<1x256xf32, #tpu.memory_space<vmem>>) attributes {dimension_semantics = [#tpu.dimension_semantics<parallel>], iteration_bounds = array<i64: 1>, scalar_prefetch = 0 : i64, scratch_operands = 0 : i64, tpu.core_type = #tpu.core_type<tc>, window_params = [{transform_indices = @transform_0, window_bounds = array<i64: 256, 32>}, {pipeline_mode = #tpu.pipeline_mode<synchronous>, transform_indices = @transform_1, window_bounds = array<i64: 128, 32>}, {pipeline_mode = #tpu.pipeline_mode<synchronous>, transform_indices = @transform_2, window_bounds = array<i64: 128, 1>}, {pipeline_mode = #tpu.pipeline_mode<synchronous>, transform_indices = @transform_3, window_bounds = array<i64: 128, 128>}, {pipeline_mode = #tpu.pipeline_mode<synchronous>, transform_indices = @transform_4, window_bounds = array<i64: 128, 1>}, {pipeline_mode = #tpu.pipeline_mode<synchronous>, transform_indices = @transform_5, window_bounds = array<i64: 128, 1>}, {transform_indices = @transform_6, window_bounds = array<i64: 1, 1>}, {transform_indices = @transform_7, window_bounds = array<i64: 1, 256>}]} {
    %c0 = arith.constant 0 : index
    %c0_0 = arith.constant 0 : index
    %0 = vector.load %arg1[%c0, %c0_0] : memref<256x32xf32, #tpu.memory_space<vmem>>, vector<256x32xf32>
    %1 = arith.truncf %0 : vector<256x32xf32> to vector<256x32xbf16>
    %c0_1 = arith.constant 0 : index
    %c0_2 = arith.constant 0 : index
    %2 = vector.load %arg2[%c0_1, %c0_2] : memref<128x32xbf16, #tpu.memory_space<vmem>>, vector<128x32xbf16>
    %cst = arith.constant dense<0.000000e+00> : vector<128x256xf32>
    %3 = tpu.matmul %2, %1, %cst {dimension_numbers = #tpu.dot_dimension_numbers<[1], [1], [0], [0], [0, 0, 1, 0], [], []>} : vector<128x32xbf16>, vector<256x32xbf16>, vector<128x256xf32> -> vector<128x256xf32>
    %c0_3 = arith.constant 0 : index
    %c0_4 = arith.constant 0 : index
    %4 = vector.load %arg3[%c0_3, %c0_4] : memref<128x1xf32, #tpu.memory_space<vmem>>, vector<128x1xf32>
    %5 = vector.broadcast %4 : vector<128x1xf32> to vector<128x256xf32>
    %6 = arith.addf %3, %5 : vector<128x256xf32>
    %cst_5 = arith.constant 0.000000e+00 : f32
    %7 = vector.broadcast %cst_5 : f32 to vector<128x256xf32>
    %8 = arith.maximumf %6, %7 : vector<128x256xf32>
    %9 = arith.truncf %8 : vector<128x256xf32> to vector<128x256xbf16>
    %c0_6 = arith.constant 0 : index
    %c0_7 = arith.constant 0 : index
    %10 = vector.load %arg4[%c0_6, %c0_7] : memref<128x128xbf16, #tpu.memory_space<vmem>>, vector<128x128xbf16>
    %cst_8 = arith.constant dense<0.000000e+00> : vector<128x256xf32>
    %11 = tpu.matmul %10, %9, %cst_8 {dimension_numbers = #tpu.dot_dimension_numbers<[1], [0], [0], [1], [0, 0, 1, 1], [], []>} : vector<128x128xbf16>, vector<128x256xbf16>, vector<128x256xf32> -> vector<128x256xf32>
    %c0_9 = arith.constant 0 : index
    %c0_10 = arith.constant 0 : index
    %12 = vector.load %arg5[%c0_9, %c0_10] : memref<128x1xf32, #tpu.memory_space<vmem>>, vector<128x1xf32>
    %13 = vector.broadcast %12 : vector<128x1xf32> to vector<128x256xf32>
    %14 = arith.addf %11, %13 : vector<128x256xf32>
    %cst_11 = arith.constant 0.000000e+00 : f32
    %15 = vector.broadcast %cst_11 : f32 to vector<128x256xf32>
    %16 = arith.maximumf %14, %15 : vector<128x256xf32>
    %c0_12 = arith.constant 0 : index
    %c0_13 = arith.constant 0 : index
    %17 = vector.load %arg6[%c0_12, %c0_13] : memref<128x1xf32, #tpu.memory_space<vmem>>, vector<128x1xf32>
    %18 = vector.broadcast %17 : vector<128x1xf32> to vector<128x256xf32>
    %19 = arith.mulf %16, %18 : vector<128x256xf32>
    %cst_14 = arith.constant dense<0.000000e+00> : vector<256xf32>
    %20 = vector.multi_reduction <add>, %19, %cst_14 [0] : vector<128x256xf32> to vector<256xf32>
    %21 = vector.shape_cast %20 : vector<256xf32> to vector<1x256xf32>
    %c0_15 = arith.constant 0 : index
    %c0_16 = arith.constant 0 : index
    %22 = memref.load %arg7[%c0_15, %c0_16] : memref<1x1xf32, #tpu.memory_space<smem>>
    %23 = vector.broadcast %22 : f32 to vector<1x256xf32>
    %24 = arith.addf %21, %23 : vector<1x256xf32>
    %c0_17 = arith.constant 0 : index
    %c0_18 = arith.constant 0 : index
    %25 = vector.load %arg8[%c0_17, %c0_18] : memref<1x256xf32, #tpu.memory_space<vmem>>, vector<1x256xf32>
    tpu.vector_store %arg8[%c0_17, %c0_18], %24 {strides = array<i32>} : memref<1x256xf32, #tpu.memory_space<vmem>>, vector<1x256xf32>,
    return
  }
  func.func @transform_0(%arg0: i32) -> (i32, i32) {
    %c0_i32 = arith.constant 0 : i32
    %c0_i32_0 = arith.constant 0 : i32
    return %arg0, %c0_i32 : i32, i32
  }
  func.func @transform_1(%arg0: i32) -> (i32, i32) {
    %c0_i32 = arith.constant 0 : i32
    %c0_i32_0 = arith.constant 0 : i32
    %c0_i32_1 = arith.constant 0 : i32
    return %c0_i32, %c0_i32_0 : i32, i32
  }
  func.func @transform_2(%arg0: i32) -> (i32, i32) {
    %c0_i32 = arith.constant 0 : i32
    %c0_i32_0 = arith.constant 0 : i32
    %c0_i32_1 = arith.constant 0 : i32
    return %c0_i32, %c0_i32_0 : i32, i32
  }
  func.func @transform_3(%arg0: i32) -> (i32, i32) {
    %c0_i32 = arith.constant 0 : i32
    %c0_i32_0 = arith.constant 0 : i32
    %c0_i32_1 = arith.constant 0 : i32
    return %c0_i32, %c0_i32_0 : i32, i32
  }
  func.func @transform_4(%arg0: i32) -> (i32, i32) {
    %c0_i32 = arith.constant 0 : i32
    %c0_i32_0 = arith.constant 0 : i32
    %c0_i32_1 = arith.constant 0 : i32
    return %c0_i32, %c0_i32_0 : i32, i32
  }
  func.func @transform_5(%arg0: i32) -> (i32, i32) {
    %c0_i32 = arith.constant 0 : i32
    %c0_i32_0 = arith.constant 0 : i32
    %c0_i32_1 = arith.constant 0 : i32
    return %c0_i32, %c0_i32_0 : i32, i32
  }
  func.func @transform_6(%arg0: i32) -> (i32, i32) {
    %c0_i32 = arith.constant 0 : i32
    %c0_i32_0 = arith.constant 0 : i32
    %c0_i32_1 = arith.constant 0 : i32
    return %c0_i32, %c0_i32_0 : i32, i32
  }
  func.func @transform_7(%arg0: i32) -> (i32, i32) {
    %c0_i32 = arith.constant 0 : i32
    %c0_i32_0 = arith.constant 0 : i32
    return %c0_i32, %arg0 : i32, i32
  }
}

</mosaic_0001>

<bundles_post_ra>
// kernel: tpu_custom_call.1
= control target key start
LH: loop header
LB: loop body
LE: loop exit
PB: predicated region body
PF: predicated region fallthrough
CT: control target
= control target key end

     0   :  { %vm229_vm0 = vcmask 261120   ;;  %v1088_v7 = vmov 0   ;;  %s1492_s0 = inlined_call_operand.vmem [shape: f32[256,32], index: 0, kind: input, shape index: {}]   ;;  %s1493_s1 = inlined_call_operand.vmem [shape: bf16[128,32], index: 1, kind: input, shape index: {}]   ;;  %s1494_s2 = inlined_call_operand.vmem [shape: f32[128,1], index: 2, kind: input, shape index: {}]   ;;  %s1495_s3 = inlined_call_operand.vmem [shape: bf16[128,128], index: 3, kind: input, shape index: {}]   ;;  %s1496_s4 = inlined_call_operand.vmem [shape: f32[128,1], index: 4, kind: input, shape index: {}]   ;;  %s1497_s5 = inlined_call_operand.vmem [shape: f32[128,1], index: 5, kind: input, shape index: {}]   ;;  %s1498_s6 = inlined_call_operand.<no memory space> [shape: f32[1,1], index: 6, kind: input, shape index: {}]   ;;  %s1499_s7 = inlined_call_operand.hbm [shape: f32[1,256], index: 7, kind: output, shape index: {}]  }
   0x1   :  { %v45_v0 = vld [vmem:[%s1492_s0 + $0x80] sm:$0xff]  ;;  %v46_v1 = vld [vmem:[%s1492_s0 + $0x88] sm:$0xff]  ;;  %v47_v5 = vld [vmem:[%s1492_s0 + $0x90] sm:$0xff]  ;;  %1046 = vset.pattern.permute.xlu0 %v1088_v7  ;;  %1047 = vset.pattern.permute.xlu1 %v1088_v7 }
   0x2   :  { %v29_v2 = vld [vmem:[%s1492_s0] sm:$0xff]  ;;  %v69_v3 = vpack.c.bf16 %v46_v1, %v45_v0  ;;  %v30_v4 = vld [vmem:[%s1492_s0 + $0x8] sm:$0xff]  ;;  %v48_v6 = vld [vmem:[%s1492_s0 + $0x98] sm:$0xff]  ;;  %655 = vmatprep.mubr.bf16.mxu1 %v1088_v7 }
   0x3   :  { %v61_v8 = vpack.c.bf16 %v30_v4, %v29_v2  ;;  %v70_v9 = vpack.c.bf16 %v48_v6, %v47_v5  ;;  %v31_v10 = vld [vmem:[%s1492_s0 + $0x10] sm:$0xff]  ;;  %v32_v11 = vld [vmem:[%s1492_s0 + $0x18] sm:$0xff]  ;;  %v49_v14 = vld [vmem:[%s1492_s0 + $0xa0] sm:$0xff] }
   0x4   :  { %1035 = vmatprep.subr.msk.bf16.mxu0 %vm229_vm0, %v69_v3  ;;  %v62_v13 = vpack.c.bf16 %v32_v11, %v31_v10  ;;  %v50_v15 = vld [vmem:[%s1492_s0 + $0xa8] sm:$0xff]  ;;  %v33_v18 = vld [vmem:[%s1492_s0 + $0x20] sm:$0xff]  ;;  %v51_v23 = vld [vmem:[%s1492_s0 + $0xb0] sm:$0xff] }
   0x5   :  { %v255_v12 = vsel %vm229_vm0, %v61_v8, 0  ;;  %v71_v17 = vpack.c.bf16 %v50_v15, %v49_v14  ;;  %v34_v19 = vld [vmem:[%s1492_s0 + $0x28] sm:$0xff]  ;;  %v1177_v20 = vld [vmem:[%s1493_s1] sm:$0xff]   ;;  %v95_v24 = vld [vmem:[%s1494_s2 + $0x10] sm:$0xff] }
   0x6   :  { %1004 = vmatpush3.bf16.xpose.msra.mxu0 %v255_v12  ;;  %v258_v16 = vsel %vm229_vm0, %v62_v13, 0  ;;  %1019 = vmatprep.mubr.msk.bf16.mxu0 %vm229_vm0, %v1177_v20  ;;  %v93_v21 = vld [vmem:[%s1494_s2] sm:$0xff]  ;;  %v63_v22 = vpack.c.bf16 %v34_v19, %v33_v18  ;;  %v52_v25 = vld [vmem:[%s1492_s0 + $0xb8] sm:$0xff]  ;;  %v94_v26 = vld [vmem:[%s1494_s2 + $0x8] sm:$0xff] }
   0x7   :  { %1036 = vmatprep.subr.msk.bf16.mxu0 %vm229_vm0, %v70_v9  ;;  %111 = vperm.xlu0 %1046, %v93_v21   ;;  %v96_v27 = vld [vmem:[%s1494_s2 + $0x18] sm:$0xff]  ;;  %v72_v29 = vpack.c.bf16 %v52_v25, %v51_v23  ;;  %v35_v30 = vld [vmem:[%s1492_s0 + $0x30] sm:$0xff]  ;;  %v97_v32 = vld [vmem:[%s1494_s2 + $0x20] sm:$0xff] }
   0x8   :  { %121 = vperm.xlu1 %1047, %v95_v24   ;;  %v261_v28 = vsel %vm229_vm0, %v63_v22, 0  ;;  %v36_v31 = vld [vmem:[%s1492_s0 + $0x38] sm:$0xff]  ;;  %v98_v33 = vld [vmem:[%s1494_s2 + $0x28] sm:$0xff]  ;;  %v53_v35 = vld [vmem:[%s1492_s0 + $0xc0] sm:$0xff] }
   0x9   :  { %v64_v34 = vpack.c.bf16 %v36_v31, %v35_v30  ;;  %v54_v36 = vld [vmem:[%s1492_s0 + $0xc8] sm:$0xff]  ;;  %v99_v37 = vld [vmem:[%s1494_s2 + $0x30] sm:$0xff]  ;;  %v100_v38 = vld [vmem:[%s1494_s2 + $0x38] sm:$0xff] }
   0xa   :  { %v73_v40 = vpack.c.bf16 %v54_v36, %v53_v35  ;;  %v37_v41 = vld [vmem:[%s1492_s0 + $0x40] sm:$0xff]  ;;  %v38_v42 = vld [vmem:[%s1492_s0 + $0x48] sm:$0xff]  ;;  %v55_v46 = vld [vmem:[%s1492_s0 + $0xd0] sm:$0xff] }
   0xb   :  { %116 = vperm.xlu0 %1046, %v94_v26   ;;  %v264_v39 = vsel %vm229_vm0, %v64_v34, 0  ;;  %v101_v43 = vld [vmem:[%s1494_s2 + $0x40] sm:$0xff]  ;;  %v102_v44 = vld [vmem:[%s1494_s2 + $0x48] sm:$0xff]  ;;  %v65_v45 = vpack.c.bf16 %v38_v42, %v37_v41  ;;  %v56_v47 = vld [vmem:[%s1492_s0 + $0xd8] sm:$0xff] }
   0xc   :  { %126 = vperm.xlu1 %1047, %v96_v27   ;;  %v103_v48 = vld [vmem:[%s1494_s2 + $0x50] sm:$0xff]  ;;  %v104_v49 = vld [vmem:[%s1494_s2 + $0x58] sm:$0xff]  ;;  %v74_v53 = vpack.c.bf16 %v56_v47, %v55_v46  ;;  %v105_v54 = vld [vmem:[%s1494_s2 + $0x60] sm:$0xff] }
   0xd   :  { %v39_v50 = vld [vmem:[%s1492_s0 + $0x50] sm:$0xff]  ;;  %v40_v51 = vld [vmem:[%s1492_s0 + $0x58] sm:$0xff]  ;;  %v267_v52 = vsel %vm229_vm0, %v65_v45, 0  ;;  %v106_v55 = vld [vmem:[%s1494_s2 + $0x68] sm:$0xff] }
   0xe   :  { %1006 = vmatpush3.bf16.xpose.msra.mxu0 %v258_v16  ;;  %v57_v56 = vld [vmem:[%s1492_s0 + $0xe0] sm:$0xff]  ;;  %v58_v57 = vld [vmem:[%s1492_s0 + $0xe8] sm:$0xff]  ;;  %v107_v58 = vld [vmem:[%s1494_s2 + $0x70] sm:$0xff]  ;;  %v66_v59 = vpack.c.bf16 %v40_v51, %v39_v50 }
   0xf   :  { %1037 = vmatprep.subr.msk.bf16.mxu0 %vm229_vm0, %v71_v17  ;;  %131 = vperm.xlu0 %1046, %v97_v32   ;;  %v108_v60 = vld [vmem:[%s1494_s2 + $0x78] sm:$0xff] }
  0x10   :  { %136 = vperm.xlu1 %1047, %v98_v33  }
  0x13   :  { %141 = vperm.xlu0 %1046, %v99_v37  }
  0x14   :  { %146 = vperm.xlu1 %1047, %v100_v38  }
  0x16   :  { %1008 = vmatpush3.bf16.xpose.msra.mxu0 %v261_v28 }
  0x17   :  { %1038 = vmatprep.subr.msk.bf16.mxu0 %vm229_vm0, %v72_v29  ;;  %151 = vperm.xlu0 %1046, %v101_v43  }
  0x18   :  { %156 = vperm.xlu1 %1047, %v102_v44  }
  0x1b   :  { %161 = vperm.xlu0 %1046, %v103_v48  }
  0x1c   :  { %166 = vperm.xlu1 %1047, %v104_v49  }
  0x1e   :  { %1010 = vmatpush3.bf16.xpose.msra.mxu0 %v264_v39 }
  0x1f   :  { %1039 = vmatprep.subr.msk.bf16.mxu0 %vm229_vm0, %v73_v40  ;;  %171 = vperm.xlu0 %1046, %v105_v54  }
  0x20   :  { %176 = vperm.xlu1 %1047, %v106_v55  }
  0x26   :  { %1012 = vmatpush3.bf16.xpose.msra.mxu0 %v267_v52 }
  0x27   :  { %1040 = vmatprep.subr.msk.bf16.mxu0 %vm229_vm0, %v74_v53 }
  0x28   :  { %13 = vsyncpa [#allocation4], 0  ;;  %v270_v61 = vsel %vm229_vm0, %v66_v59, 0  ;;  %v75_v62 = vpack.c.bf16 %v58_v57, %v57_v56  ;;  %181 = vperm.xlu0 %1046, %v107_v58   ;;  %v41_v63 = vld [vmem:[%s1492_s0 + $0x60] sm:$0xff]  ;;  %v42_v0 = vld [vmem:[%s1492_s0 + $0x68] sm:$0xff]  ;;  %186 = vperm.xlu1 %1047, %v108_v60   ;;  %s1090_s22 = smov [#allocation3]  }
  0x29   :  { %v479_v1 = vld [vmem:[%s1496_s4] sm:$0xff]  ;;  %v480_v2 = vld [vmem:[%s1496_s4 + $0x8] sm:$0xff]  ;;  %v67_v3 = vpack.c.bf16 %v42_v0, %v41_v63  ;;  %v59_v4 = vld [vmem:[%s1492_s0 + $0xf0] sm:$0xff]  ;;  %s971_s23 = sshll.u32 %s1090_s22, 4  ;;  %s972_s23 = int_to_ptr.vmem [resolvable:$true] %s971_s23 }
  0x2a   :  { %v60_v5 = vld [vmem:[%s1492_s0 + $0xf8] sm:$0xff]  ;;  %v481_v6 = vld [vmem:[%s1496_s4 + $0x10] sm:$0xff]  ;;  %v768_v13 = vld [vmem:[%s1497_s5] sm:$0xff]  ;;  %s1064_s24 = scalar_lea.vmem %s972_s23, 32  ;;  %p1069_p1 = scmp.lt.s32.totalorder %s972_s23, %s972_s23 }
  0x2b   :  { %v482_v8 = vld [vmem:[%s1496_s4 + $0x18] sm:$0xff]  ;;  %v273_v9 = vsel %vm229_vm0, %v67_v3, 0  ;;  %v76_v10 = vpack.c.bf16 %v60_v5, %v59_v4  ;;  %v43_v11 = vld [vmem:[%s1492_s0 + $0x70] sm:$0xff]  ;;  %v769_v14 = vld [vmem:[%s1497_s5 + $0x8] sm:$0xff]  ;;  %p1065_p0 = scmp.ne.s32.totalorder %s972_s23, %s1064_s24  ;;  %p1070_p2 = scmp.lt.s32.totalorder %s1064_s24, %s1064_s24 }
  0x2c   :  { %497 = vperm.xlu0 %1046, %v479_v1   ;;  %502 = vperm.xlu1 %1047, %v480_v2   ;;  %v44_v12 = vld [vmem:[%s1492_s0 + $0x78] sm:$0xff]  ;;  %v483_v16 = vld [vmem:[%s1496_s4 + $0x20] sm:$0xff]  ;;  %v770_v17 = vld [vmem:[%s1497_s5 + $0x10] sm:$0xff] }
  0x2d   :  { %v68_v15 = vpack.c.bf16 %v44_v12, %v43_v11  ;;  %v484_v19 = vld [vmem:[%s1496_s4 + $0x28] sm:$0xff]  ;;  %v771_v21 = vld [vmem:[%s1497_s5 + $0x18] sm:$0xff]  ;;  %v485_v22 = vld [vmem:[%s1496_s4 + $0x30] sm:$0xff]  ;;  %p1071_p3 = por %p1070_p2, %p1069_p1 }
  0x2e   :  { %1014 = vmatpush3.bf16.xpose.msra.mxu0 %v270_v61  ;;  %v772_v23 = vld [vmem:[%s1497_s5 + $0x20] sm:$0xff]  ;;  %v1049_v24 = vld [vmem:[%s1493_s1 + $0x8] sm:$0xff]   ;;  %v486_v25 = vld [vmem:[%s1496_s4 + $0x38] sm:$0xff] }
  0x2f   :  { %1041 = vmatprep.subr.msk.bf16.mxu0 %vm229_vm0, %v75_v62  ;;  %v276_v18 = vsel %vm229_vm0, %v68_v15, 0  ;;  %v773_v26 = vld [vmem:[%s1497_s5 + $0x28] sm:$0xff]  ;;  %v487_v27 = vld [vmem:[%s1496_s4 + $0x40] sm:$0xff]  ;;  %v774_v28 = vld [vmem:[%s1497_s5 + $0x30] sm:$0xff]  ;;  %p1072_p4 = pnand %p1071_p3, %p1065_p0 }
  0x30   :  { %507 = vperm.xlu0 %1046, %v481_v6   ;;  %512 = vperm.xlu1 %1047, %v482_v8   ;;  %v488_v29 = vld [vmem:[%s1496_s4 + $0x48] sm:$0xff]  ;;  %v775_v30 = vld [vmem:[%s1497_s5 + $0x38] sm:$0xff]  ;;  %v489_v31 = vld [vmem:[%s1496_s4 + $0x50] sm:$0xff] }
  0x31   :  { %v776_v32 = vld [vmem:[%s1497_s5 + $0x40] sm:$0xff]  ;;  %v1051_v33 = vld [vmem:[%s1493_s1 + $0x18] sm:$0xff]   ;;  %v777_v35 = vld [vmem:[%s1497_s5 + $0x48] sm:$0xff] }
  0x32   :  { %v490_v34 = vld [vmem:[%s1496_s4 + $0x58] sm:$0xff]  ;;  %v491_v36 = vld [vmem:[%s1496_s4 + $0x60] sm:$0xff]  ;;  %v778_v37 = vld [vmem:[%s1497_s5 + $0x50] sm:$0xff] }
  0x33   :  { %v1052_v38 = vld [vmem:[%s1493_s1 + $0x20] sm:$0xff]   ;;  %v492_v39 = vld [vmem:[%s1496_s4 + $0x68] sm:$0xff]  ;;  %v779_v40 = vld [vmem:[%s1497_s5 + $0x58] sm:$0xff] }
  0x34   :  { %786 = vperm.xlu0 %1046, %v768_v13   ;;  %791 = vperm.xlu1 %1047, %v769_v14   ;;  %v493_v41 = vld [vmem:[%s1496_s4 + $0x70] sm:$0xff]  ;;  %v780_v42 = vld [vmem:[%s1497_s5 + $0x60] sm:$0xff]  ;;  %v1053_v43 = vld [vmem:[%s1493_s1 + $0x28] sm:$0xff]  }
  0x35   :  { %v494_v44 = vld [vmem:[%s1496_s4 + $0x78] sm:$0xff]  ;;  %v781_v45 = vld [vmem:[%s1497_s5 + $0x68] sm:$0xff]  ;;  %v782_v46 = vld [vmem:[%s1497_s5 + $0x70] sm:$0xff] }
  0x36   :  { %1016 = vmatpush3.bf16.xpose.msra.mxu0 %v273_v9  ;;  %v783_v47 = vld [vmem:[%s1497_s5 + $0x78] sm:$0xff]  ;;  %v1054_v48 = vld [vmem:[%s1493_s1 + $0x30] sm:$0xff]  }
  0x37   :  { %1042 = vmatprep.subr.msk.bf16.mxu0 %vm229_vm0, %v76_v10  ;;  %v1055_v49 = vld [vmem:[%s1493_s1 + $0x38] sm:$0xff]  }
  0x38   :  { %517 = vperm.xlu0 %1046, %v483_v16   ;;  %796 = vperm.xlu1 %1047, %v770_v17  }
  0x3c   :  { %522 = vperm.xlu0 %1046, %v484_v19   ;;  %801 = vperm.xlu1 %1047, %v771_v21  }
  0x3e   :  { %1018 = vmatpush3.bf16.xpose.msra.mxu0 %v276_v18 }
  0x40   :  { %527 = vperm.xlu0 %1046, %v485_v22   ;;  %806 = vperm.xlu1 %1047, %v772_v23  }
  0x44   :  { %532 = vperm.xlu0 %1046, %v486_v25   ;;  %811 = vperm.xlu1 %1047, %v773_v26  }
  0x45   :  { %1020 = vmatmul.mubr.msk.bf16.vlgmr.msra.gmra.mrb[0].mxu0 %vm229_vm0, %v1177_v20  ;;  %v1050_v20 = vld [vmem:[%s1493_s1 + $0x10] sm:$0xff]  }
  0x46   :  { %1021 = vmatprep.mubr.msk.bf16.mxu0 %vm229_vm0, %v1049_v24 }
  0x48   :  { %537 = vperm.xlu0 %1046, %v487_v27   ;;  %816 = vperm.xlu1 %1047, %v774_v28  }
  0x4c   :  { %542 = vperm.xlu0 %1046, %v488_v29   ;;  %821 = vperm.xlu1 %1047, %v775_v30  }
  0x4d   :  { %1022 = vmatmul.mubr.msk.bf16.gmra.mrb[4].mxu0 %vm229_vm0, %v1049_v24 }
  0x4e   :  { %1023 = vmatprep.mubr.msk.bf16.mxu0 %vm229_vm0, %v1050_v20 }
  0x50   :  { %547 = vperm.xlu0 %1046, %v489_v31   ;;  %826 = vperm.xlu1 %1047, %v776_v32  }
  0x54   :  { %552 = vperm.xlu0 %1046, %v490_v34   ;;  %831 = vperm.xlu1 %1047, %v777_v35  }
  0x55   :  { %1024 = vmatmul.mubr.msk.bf16.gmra.mrb[8].mxu0 %vm229_vm0, %v1050_v20 }
  0x56   :  { %1025 = vmatprep.mubr.msk.bf16.mxu0 %vm229_vm0, %v1051_v33 }
  0x58   :  { %557 = vperm.xlu0 %1046, %v491_v36   ;;  %836 = vperm.xlu1 %1047, %v778_v37  }
  0x5c   :  { %562 = vperm.xlu0 %1046, %v492_v39   ;;  %841 = vperm.xlu1 %1047, %v779_v40  }
  0x5d   :  { %1026 = vmatmul.mubr.msk.bf16.gmra.mrb[12].mxu0 %vm229_vm0, %v1051_v33 }
  0x5e   :  { %1027 = vmatprep.mubr.msk.bf16.mxu0 %vm229_vm0, %v1052_v38 }
  0x60   :  { %567 = vperm.xlu0 %1046, %v493_v41   ;;  %846 = vperm.xlu1 %1047, %v780_v42  }
  0x64   :  { %572 = vperm.xlu0 %1046, %v494_v44   ;;  %851 = vperm.xlu1 %1047, %v781_v45  }
  0x65   :  { %1028 = vmatmul.mubr.msk.bf16.gmra.mrb[16].mxu0 %vm229_vm0, %v1052_v38 }
  0x66   :  { %1029 = vmatprep.mubr.msk.bf16.mxu0 %vm229_vm0, %v1053_v43 }
  0x68   :  { %856 = vperm.xlu0 %1046, %v782_v46   ;;  %861 = vperm.xlu1 %1047, %v783_v47  }
  0x6d   :  { %1030 = vmatmul.mubr.msk.bf16.gmra.mrb[20].mxu0 %vm229_vm0, %v1053_v43 }
  0x6e   :  { %1031 = vmatprep.mubr.msk.bf16.mxu0 %vm229_vm0, %v1054_v48 }
  0x75   :  { %1032 = vmatmul.mubr.msk.bf16.gmra.mrb[24].mxu0 %vm229_vm0, %v1054_v48 }
  0x76   :  { %1033 = vmatprep.mubr.msk.bf16.mxu0 %vm229_vm0, %v1055_v49 }
  0x7d   :  { %1034 = vmatmul.mubr.msk.bf16.gmra.mrb[28].mxu0 %vm229_vm0, %v1055_v49 }
  0x86   :  { %v112_v50 = vpop.permute.xlu0 %111 }
  0x87   :  { %v122_v59 = vpop.permute.xlu1 %121 }
  0x8a   :  { %v117_v54 = vpop.permute.xlu0 %116 }
  0x8b   :  { %v127_v6 = vpop.permute.xlu1 %126 }
  0x8e   :  { %v132_v18 = vpop.permute.xlu0 %131 }
  0x8f   :  { %v137_v24 = vpop.permute.xlu1 %136 }
  0x92   :  { %v142_v34 = vpop.permute.xlu0 %141 }
  0x93   :  { %v147_v39 = vpop.permute.xlu1 %146 }
 0x118   :  { %v336_v51 = vpop.f32.mrb[0].mxu0 }
 0x119   :  { %v337_v52 = vadd.f32 %v336_v51, %v112_v50  ;;  %v338_v53 = vpop.f32.mrb[1].mxu0 }
 0x11a   :  { %v339_v55 = vadd.f32 %v338_v53, %v112_v50  ;;  %v340_v56 = vpop.f32.mrb[2].mxu0  ;;  %v152_v50 = vpop.permute.xlu0 %151 }
 0x11b   :  { %v341_v57 = vadd.f32 %v340_v56, %v117_v54  ;;  %v342_v58 = vpop.f32.mrb[3].mxu0  ;;  %v415_v61 = vmax.f32 %v337_v52, 0.0 }
 0x11c   :  { %v343_v60 = vadd.f32 %v342_v58, %v117_v54  ;;  %v416_v63 = vmax.f32 %v339_v55, 0.0  ;;  %v157_v55 = vpop.permute.xlu1 %156 }
 0x11d   :  { %v417_v62 = vmax.f32 %v341_v57, 0.0 }
 0x11e   :  { %v418_v0 = vmax.f32 %v343_v60, 0.0 }
 0x11f   :  { %v447_v1 = vpack.c.bf16 %v417_v62, %v415_v61 }
 0x120   :  { %v346_v2 = vpop.f32.mrb[4].mxu0  ;;  %v448_v3 = vpack.c.bf16 %v418_v0, %v416_v63 }
 0x121   :  { %v347_v4 = vadd.f32 %v346_v2, %v122_v59  ;;  %v348_v5 = vpop.f32.mrb[5].mxu0  ;;  %v162_v2 = vpop.permute.xlu0 %161 }
 0x122   :  { %v349_v8 = vadd.f32 %v348_v5, %v122_v59  ;;  %v350_v9 = vpop.f32.mrb[6].mxu0  ;;  %623 = vmatprep.subr.bf16.mxu1 %v448_v3 }
 0x123   :  { %v351_v10 = vadd.f32 %v350_v9, %v127_v6  ;;  %v352_v11 = vpop.f32.mrb[7].mxu0  ;;  %624 = vmatpush1.bf16.msra.mxu1 %v447_v1  ;;  %v419_v13 = vmax.f32 %v347_v4, 0.0 }
 0x124   :  { %v353_v12 = vadd.f32 %v352_v11, %v127_v6  ;;  %v420_v15 = vmax.f32 %v349_v8, 0.0  ;;  %v167_v8 = vpop.permute.xlu1 %166 }
 0x125   :  { %v421_v14 = vmax.f32 %v351_v10, 0.0 }
 0x126   :  { %v422_v16 = vmax.f32 %v353_v12, 0.0 }
 0x127   :  { %v449_v17 = vpack.c.bf16 %v421_v14, %v419_v13 }
 0x128   :  { %v450_v19 = vpack.c.bf16 %v422_v16, %v420_v15  ;;  %v356_v21 = vpop.f32.mrb[8].mxu0 }
 0x129   :  { %v357_v22 = vadd.f32 %v356_v21, %v132_v18  ;;  %v358_v23 = vpop.f32.mrb[9].mxu0 }
 0x12a   :  { %v359_v25 = vadd.f32 %v358_v23, %v132_v18  ;;  %v360_v26 = vpop.f32.mrb[10].mxu0  ;;  %625 = vmatprep.subr.bf16.mxu1 %v450_v19  ;;  %v172_v19 = vpop.permute.xlu0 %171 }
 0x12b   :  { %v361_v27 = vadd.f32 %v360_v26, %v137_v24  ;;  %v362_v28 = vpop.f32.mrb[11].mxu0  ;;  %626 = vmatpush1.bf16.msra.mxu1 %v449_v17  ;;  %v423_v29 = vmax.f32 %v357_v22, 0.0 }
 0x12c   :  { %v363_v20 = vadd.f32 %v362_v28, %v137_v24  ;;  %v424_v31 = vmax.f32 %v359_v25, 0.0  ;;  %v177_v25 = vpop.permute.xlu1 %176 }
 0x12d   :  { %v425_v30 = vmax.f32 %v361_v27, 0.0 }
 0x12e   :  { %v426_v32 = vmax.f32 %v363_v20, 0.0 }
 0x12f   :  { %v451_v33 = vpack.c.bf16 %v425_v30, %v423_v29 }
 0x130   :  { %v452_v35 = vpack.c.bf16 %v426_v32, %v424_v31  ;;  %v366_v36 = vpop.f32.mrb[12].mxu0 }
 0x131   :  { %v367_v37 = vadd.f32 %v366_v36, %v142_v34  ;;  %v368_v38 = vpop.f32.mrb[13].mxu0 }
 0x132   :  { %v369_v40 = vadd.f32 %v368_v38, %v142_v34  ;;  %v370_v41 = vpop.f32.mrb[14].mxu0  ;;  %627 = vmatprep.subr.bf16.mxu1 %v452_v35  ;;  %v182_v35 = vpop.permute.xlu0 %181 }
 0x133   :  { %v371_v42 = vadd.f32 %v370_v41, %v147_v39  ;;  %v372_v43 = vpop.f32.mrb[15].mxu0  ;;  %628 = vmatpush1.bf16.msra.mxu1 %v451_v33  ;;  %v427_v45 = vmax.f32 %v367_v37, 0.0 }
 0x134   :  { %v373_v44 = vadd.f32 %v372_v43, %v147_v39  ;;  %v428_v47 = vmax.f32 %v369_v40, 0.0  ;;  %v187_v40 = vpop.permute.xlu1 %186 }
 0x135   :  { %v429_v46 = vmax.f32 %v371_v42, 0.0 }
 0x136   :  { %v430_v48 = vmax.f32 %v373_v44, 0.0 }
 0x137   :  { %v453_v49 = vpack.c.bf16 %v429_v46, %v427_v45 }
 0x138   :  { %v454_v51 = vpack.c.bf16 %v430_v48, %v428_v47  ;;  %v376_v52 = vpop.f32.mrb[16].mxu0 }
 0x139   :  { %v377_v53 = vadd.f32 %v376_v52, %v152_v50  ;;  %v378_v54 = vpop.f32.mrb[17].mxu0  ;;  %v1056_v52 = vld [vmem:[%s1495_s3] sm:$0xff]  }
 0x13a   :  { %v379_v56 = vadd.f32 %v378_v54, %v152_v50  ;;  %v380_v57 = vpop.f32.mrb[18].mxu0  ;;  %629 = vmatprep.subr.bf16.mxu1 %v454_v51  ;;  %v1058_v54 = vld [vmem:[%s1495_s3 + $0x10] sm:$0xff]  }
 0x13b   :  { %v381_v58 = vadd.f32 %v380_v57, %v157_v55  ;;  %v382_v59 = vpop.f32.mrb[19].mxu0  ;;  %630 = vmatpush1.bf16.msra.mxu1 %v453_v49  ;;  %v431_v61 = vmax.f32 %v377_v53, 0.0  ;;  %v1057_v53 = vld [vmem:[%s1495_s3 + $0x8] sm:$0xff]  }
 0x13c   :  { %v383_v60 = vadd.f32 %v382_v59, %v157_v55  ;;  %v432_v63 = vmax.f32 %v379_v56, 0.0  ;;  %v1059_v55 = vld [vmem:[%s1495_s3 + $0x18] sm:$0xff]   ;;  %v1060_v56 = vld [vmem:[%s1495_s3 + $0x20] sm:$0xff]   ;;  %v1061_v57 = vld [vmem:[%s1495_s3 + $0x28] sm:$0xff]  }
 0x13d   :  { %v433_v62 = vmax.f32 %v381_v58, 0.0  ;;  %v1062_v58 = vld [vmem:[%s1495_s3 + $0x30] sm:$0xff]   ;;  %v1063_v59 = vld [vmem:[%s1495_s3 + $0x38] sm:$0xff]  }
 0x13e   :  { %v434_v0 = vmax.f32 %v383_v60, 0.0  ;;  %v498_v60 = vpop.permute.xlu0 %497 }
 0x13f   :  { %v455_v1 = vpack.c.bf16 %v433_v62, %v431_v61  ;;  %v503_v61 = vpop.permute.xlu1 %502 }
 0x140   :  { %v456_v3 = vpack.c.bf16 %v434_v0, %v432_v63  ;;  %v386_v4 = vpop.f32.mrb[20].mxu0 }
 0x141   :  { %v387_v5 = vadd.f32 %v386_v4, %v162_v2  ;;  %v388_v6 = vpop.f32.mrb[21].mxu0 }
 0x142   :  { %v389_v9 = vadd.f32 %v388_v6, %v162_v2  ;;  %v390_v10 = vpop.f32.mrb[22].mxu0  ;;  %631 = vmatprep.subr.bf16.mxu1 %v456_v3  ;;  %v508_v62 = vpop.permute.xlu0 %507 }
 0x143   :  { %v391_v11 = vadd.f32 %v390_v10, %v167_v8  ;;  %v392_v12 = vpop.f32.mrb[23].mxu0  ;;  %632 = vmatpush1.bf16.msra.mxu1 %v455_v1  ;;  %v435_v14 = vmax.f32 %v387_v5, 0.0  ;;  %v513_v63 = vpop.permute.xlu1 %512 }
 0x144   :  { %v393_v13 = vadd.f32 %v392_v12, %v167_v8  ;;  %v436_v16 = vmax.f32 %v389_v9, 0.0 }
 0x145   :  { %v437_v15 = vmax.f32 %v391_v11, 0.0 }
 0x146   :  { %v438_v17 = vmax.f32 %v393_v13, 0.0  ;;  %v787_v0 = vpop.permute.xlu0 %786 }
 0x147   :  { %v457_v18 = vpack.c.bf16 %v437_v15, %v435_v14  ;;  %v792_v1 = vpop.permute.xlu1 %791 }
 0x148   :  { %v458_v21 = vpack.c.bf16 %v438_v17, %v436_v16  ;;  %v396_v22 = vpop.f32.mrb[24].mxu0 }
 0x149   :  { %v397_v23 = vadd.f32 %v396_v22, %v172_v19  ;;  %v398_v24 = vpop.f32.mrb[25].mxu0 }
 0x14a   :  { %v399_v26 = vadd.f32 %v398_v24, %v172_v19  ;;  %v400_v27 = vpop.f32.mrb[26].mxu0  ;;  %633 = vmatprep.subr.bf16.mxu1 %v458_v21  ;;  %v518_v2 = vpop.permute.xlu0 %517 }
 0x14b   :  { %v401_v28 = vadd.f32 %v400_v27, %v177_v25  ;;  %v402_v20 = vpop.f32.mrb[27].mxu0  ;;  %634 = vmatpush1.bf16.msra.mxu1 %v457_v18  ;;  %v439_v30 = vmax.f32 %v397_v23, 0.0  ;;  %v797_v3 = vpop.permute.xlu1 %796 }
 0x14c   :  { %v403_v29 = vadd.f32 %v402_v20, %v177_v25  ;;  %v440_v32 = vmax.f32 %v399_v26, 0.0 }
 0x14d   :  { %v441_v31 = vmax.f32 %v401_v28, 0.0 }
 0x14e   :  { %v442_v33 = vmax.f32 %v403_v29, 0.0  ;;  %v523_v4 = vpop.permute.xlu0 %522 }
 0x14f   :  { %v459_v34 = vpack.c.bf16 %v441_v31, %v439_v30  ;;  %v802_v5 = vpop.permute.xlu1 %801 }
 0x150   :  { %v460_v36 = vpack.c.bf16 %v442_v33, %v440_v32  ;;  %v406_v37 = vpop.f32.mrb[28].mxu0 }
 0x151   :  { %v407_v38 = vadd.f32 %v406_v37, %v182_v35  ;;  %v408_v39 = vpop.f32.mrb[29].mxu0 }
 0x152   :  { %v409_v41 = vadd.f32 %v408_v39, %v182_v35  ;;  %v410_v42 = vpop.f32.mrb[30].mxu0  ;;  %635 = vmatprep.subr.bf16.mxu1 %v460_v36  ;;  %v1465_v6 = vpop.permute.xlu0 %527 }
 0x153   :  { %v411_v43 = vadd.f32 %v410_v42, %v187_v40  ;;  %v412_v44 = vpop.f32.mrb[31].mxu0  ;;  %636 = vmatpush1.bf16.msra.mxu1 %v459_v34  ;;  %v443_v46 = vmax.f32 %v407_v38, 0.0  ;;  %v807_v8 = vpop.permute.xlu1 %806 }
 0x154   :  { %v413_v45 = vadd.f32 %v412_v44, %v187_v40  ;;  %v444_v48 = vmax.f32 %v409_v41, 0.0 }
 0x155   :  { %v445_v47 = vmax.f32 %v411_v43, 0.0 }
 0x156   :  { %v446_v49 = vmax.f32 %v413_v45, 0.0  ;;  %v1467_v18 = vpop.permute.xlu0 %532 }
 0x157   :  { %v461_v50 = vpack.c.bf16 %v445_v47, %v443_v46  ;;  %v812_v21 = vpop.permute.xlu1 %811 }
 0x158   :  { %v462_v51 = vpack.c.bf16 %v446_v49, %v444_v48 }
 0x15a   :  { %637 = vmatprep.subr.bf16.mxu1 %v462_v51  ;;  %v1469_v33 = vpop.permute.xlu0 %537 }
 0x15b   :  { %638 = vmatpush1.bf16.msra.mxu1 %v461_v50  ;;  %v817_v37 = vpop.permute.xlu1 %816 }
 0x15e   :  { %656 = vmatmul.mubr.bf16.vlgmr.msra.gmra.mrb[0].mxu1 %v1056_v52  ;;  %v543_v49 = vpop.permute.xlu0 %542 }
 0x15f   :  { %665 = vmatprep.mubr.bf16.mxu1 %v1088_v7 }
 0x166   :  { %666 = vmatmul.mubr.bf16.gmra.mrb[4].mxu1 %v1057_v53  ;;  %v822_v53 = vpop.permute.xlu1 %821 }
 0x167   :  { %675 = vmatprep.mubr.bf16.mxu1 %v1088_v7 }
 0x16e   :  { %676 = vmatmul.mubr.bf16.gmra.mrb[8].mxu1 %v1058_v54 }
 0x16f   :  { %685 = vmatprep.mubr.bf16.mxu1 %v1088_v7 }
 0x176   :  { %686 = vmatmul.mubr.bf16.gmra.mrb[12].mxu1 %v1059_v55 }
 0x177   :  { %695 = vmatprep.mubr.bf16.mxu1 %v1088_v7 }
 0x17e   :  { %696 = vmatmul.mubr.bf16.gmra.mrb[16].mxu1 %v1060_v56 }
 0x17f   :  { %705 = vmatprep.mubr.bf16.mxu1 %v1088_v7 }
 0x186   :  { %706 = vmatmul.mubr.bf16.gmra.mrb[20].mxu1 %v1061_v57 }
 0x187   :  { %715 = vmatprep.mubr.bf16.mxu1 %v1088_v7 }
 0x18e   :  { %716 = vmatmul.mubr.bf16.gmra.mrb[24].mxu1 %v1062_v58 }
 0x18f   :  { %725 = vmatprep.mubr.bf16.mxu1 %v1088_v7 }
 0x196   :  { %726 = vmatmul.mubr.bf16.gmra.mrb[28].mxu1 %v1063_v59 }
 0x231   :  { %v657_v9 = vpop.f32.mrb[0].mxu1 }
 0x232   :  { %v658_v7 = vadd.f32 %v657_v9, %v498_v60  ;;  %v659_v10 = vpop.f32.mrb[1].mxu1 }
 0x233   :  { %v660_v11 = vadd.f32 %v659_v10, %v498_v60  ;;  %v661_v12 = vpop.f32.mrb[2].mxu1 }
 0x234   :  { %v736_v13 = vmax.f32 %v658_v7, 0.0  ;;  %v662_v14 = vadd.f32 %v661_v12, %v503_v61  ;;  %v663_v15 = vpop.f32.mrb[3].mxu1  ;;  %v827_v7 = vpop.permute.xlu1 %826 }
 0x235   :  { %v737_v16 = vmax.f32 %v660_v11, 0.0  ;;  %v664_v17 = vadd.f32 %v663_v15, %v503_v61 }
 0x236   :  { %v738_v19 = vmax.f32 %v662_v14, 0.0  ;;  %v864_v23 = vmul.f32 %v787_v0, %v736_v13 }
 0x237   :  { %v739_v22 = vmax.f32 %v664_v17, 0.0  ;;  %v865_v25 = vmul.f32 %v787_v0, %v737_v16 }
 0x238   :  { %v866_v24 = vmul.f32 %v792_v1, %v738_v19 }
 0x239   :  { %v867_v26 = vmul.f32 %v792_v1, %v739_v22  ;;  %v667_v27 = vpop.f32.mrb[4].mxu1 }
 0x23a   :  { %v896_v28 = vadd.f32 %v866_v24, %v864_v23  ;;  %v668_v20 = vadd.f32 %v667_v27, %v508_v62  ;;  %v669_v29 = vpop.f32.mrb[5].mxu1 }
 0x23b   :  { %v917_v30 = vadd.f32 %v867_v26, %v865_v25  ;;  %v670_v31 = vadd.f32 %v669_v29, %v508_v62  ;;  %v671_v32 = vpop.f32.mrb[6].mxu1 }
 0x23c   :  { %v740_v34 = vmax.f32 %v668_v20, 0.0  ;;  %v672_v35 = vadd.f32 %v671_v32, %v513_v63  ;;  %v673_v36 = vpop.f32.mrb[7].mxu1 }
 0x23d   :  { %v741_v38 = vmax.f32 %v670_v31, 0.0  ;;  %v674_v39 = vadd.f32 %v673_v36, %v513_v63 }
 0x23e   :  { %v868_v40 = vmul.f32 %v797_v3, %v740_v34  ;;  %v742_v41 = vmax.f32 %v672_v35, 0.0 }
 0x23f   :  { %v869_v42 = vmul.f32 %v797_v3, %v741_v38  ;;  %v743_v43 = vmax.f32 %v674_v39, 0.0  ;;  %v548_v3 = vpop.permute.xlu0 %547 }
 0x240   :  { %v897_v44 = vadd.f32 %v896_v28, %v868_v40  ;;  %v870_v45 = vmul.f32 %v802_v5, %v742_v41 }
 0x241   :  { %v918_v46 = vadd.f32 %v917_v30, %v869_v42  ;;  %v871_v47 = vmul.f32 %v802_v5, %v743_v43  ;;  %v677_v48 = vpop.f32.mrb[8].mxu1 }
 0x242   :  { %v898_v50 = vadd.f32 %v897_v44, %v870_v45  ;;  %v678_v51 = vadd.f32 %v677_v48, %v518_v2  ;;  %v679_v52 = vpop.f32.mrb[9].mxu1 }
 0x243   :  { %v919_v54 = vadd.f32 %v918_v46, %v871_v47  ;;  %v680_v55 = vadd.f32 %v679_v52, %v518_v2  ;;  %v681_v56 = vpop.f32.mrb[10].mxu1  ;;  %v553_v24 = vpop.permute.xlu0 %552 }
 0x244   :  { %v744_v57 = vmax.f32 %v678_v51, 0.0  ;;  %v682_v58 = vadd.f32 %v681_v56, %v523_v4  ;;  %v683_v59 = vpop.f32.mrb[11].mxu1 }
 0x245   :  { %v745_v60 = vmax.f32 %v680_v55, 0.0  ;;  %v684_v61 = vadd.f32 %v683_v59, %v523_v4 }
 0x246   :  { %v872_v62 = vmul.f32 %v807_v8, %v744_v57  ;;  %v746_v63 = vmax.f32 %v682_v58, 0.0 }
 0x247   :  { %v873_v0 = vmul.f32 %v807_v8, %v745_v60  ;;  %v747_v1 = vmax.f32 %v684_v61, 0.0 }
 0x248   :  { %v899_v5 = vadd.f32 %v898_v50, %v872_v62  ;;  %v874_v9 = vmul.f32 %v812_v21, %v746_v63 }
 0x249   :  { %v920_v10 = vadd.f32 %v919_v54, %v873_v0  ;;  %v875_v11 = vmul.f32 %v812_v21, %v747_v1  ;;  %v687_v12 = vpop.f32.mrb[12].mxu1  ;;  %v832_v21 = vpop.permute.xlu1 %831 }
 0x24a   :  { %v900_v13 = vadd.f32 %v899_v5, %v874_v9  ;;  %v688_v2 = vadd.f32 %v687_v12, %v1465_v6  ;;  %v689_v14 = vpop.f32.mrb[13].mxu1 }
 0x24b   :  { %v921_v15 = vadd.f32 %v920_v10, %v875_v11  ;;  %v690_v16 = vadd.f32 %v689_v14, %v1465_v6  ;;  %v691_v17 = vpop.f32.mrb[14].mxu1 }
 0x24c   :  { %v748_v4 = vmax.f32 %v688_v2, 0.0  ;;  %v692_v19 = vadd.f32 %v691_v17, %v1467_v18  ;;  %v693_v8 = vpop.f32.mrb[15].mxu1 }
 0x24d   :  { %v749_v22 = vmax.f32 %v690_v16, 0.0  ;;  %v694_v23 = vadd.f32 %v693_v8, %v1467_v18  ;;  %v558_v18 = vpop.permute.xlu0 %557  ;;  %v837_v43 = vpop.permute.xlu1 %836 }
 0x24e   :  { %v876_v25 = vmul.f32 %v817_v37, %v748_v4  ;;  %v750_v26 = vmax.f32 %v692_v19, 0.0 }
 0x24f   :  { %v877_v27 = vmul.f32 %v817_v37, %v749_v22  ;;  %v751_v28 = vmax.f32 %v694_v23, 0.0 }
 0x250   :  { %v901_v20 = vadd.f32 %v900_v13, %v876_v25  ;;  %v878_v29 = vmul.f32 %v822_v53, %v750_v26 }
 0x251   :  { %v922_v30 = vadd.f32 %v921_v15, %v877_v27  ;;  %v879_v31 = vmul.f32 %v822_v53, %v751_v28  ;;  %v697_v32 = vpop.f32.mrb[16].mxu1  ;;  %v563_v55 = vpop.permute.xlu0 %562 }
 0x252   :  { %v902_v6 = vadd.f32 %v901_v20, %v878_v29  ;;  %v698_v34 = vadd.f32 %v697_v32, %v1469_v33  ;;  %v699_v35 = vpop.f32.mrb[17].mxu1  ;;  %v842_v58 = vpop.permute.xlu1 %841 }
 0x253   :  { %v923_v36 = vadd.f32 %v922_v30, %v879_v31  ;;  %v700_v38 = vadd.f32 %v699_v35, %v1469_v33  ;;  %v701_v39 = vpop.f32.mrb[18].mxu1 }
 0x254   :  { %v752_v40 = vmax.f32 %v698_v34, 0.0  ;;  %v702_v41 = vadd.f32 %v701_v39, %v543_v49  ;;  %v703_v42 = vpop.f32.mrb[19].mxu1 }
 0x255   :  { %v753_v37 = vmax.f32 %v700_v38, 0.0  ;;  %v704_v44 = vadd.f32 %v703_v42, %v543_v49  ;;  %v568_v11 = vpop.permute.xlu0 %567 }
 0x256   :  { %v880_v45 = vmul.f32 %v827_v7, %v752_v40  ;;  %v754_v46 = vmax.f32 %v702_v41, 0.0  ;;  %v847_v2 = vpop.permute.xlu1 %846 }
 0x257   :  { %v881_v47 = vmul.f32 %v827_v7, %v753_v37  ;;  %v755_v48 = vmax.f32 %v704_v44, 0.0 }
 0x258   :  { %v903_v50 = vadd.f32 %v902_v6, %v880_v45  ;;  %v882_v51 = vmul.f32 %v832_v21, %v754_v46 }
 0x259   :  { %v924_v52 = vadd.f32 %v923_v36, %v881_v47  ;;  %v883_v53 = vmul.f32 %v832_v21, %v755_v48  ;;  %v707_v54 = vpop.f32.mrb[20].mxu1  ;;  %v573_v20 = vpop.permute.xlu0 %572 }
 0x25a   :  { %v904_v56 = vadd.f32 %v903_v50, %v882_v51  ;;  %v708_v33 = vadd.f32 %v707_v54, %v548_v3  ;;  %v709_v57 = vpop.f32.mrb[21].mxu1  ;;  %v852_v29 = vpop.permute.xlu1 %851 }
 0x25b   :  { %v925_v59 = vadd.f32 %v924_v52, %v883_v53  ;;  %v710_v60 = vadd.f32 %v709_v57, %v548_v3  ;;  %v711_v61 = vpop.f32.mrb[22].mxu1 }
 0x25c   :  { %v756_v62 = vmax.f32 %v708_v33, 0.0  ;;  %v712_v63 = vadd.f32 %v711_v61, %v553_v24  ;;  %v713_v49 = vpop.f32.mrb[23].mxu1 }
 0x25d   :  { %v757_v0 = vmax.f32 %v710_v60, 0.0  ;;  %v714_v1 = vadd.f32 %v713_v49, %v553_v24  ;;  %v857_v45 = vpop.permute.xlu0 %856 }
 0x25e   :  { %v884_v5 = vmul.f32 %v837_v43, %v756_v62  ;;  %v758_v9 = vmax.f32 %v712_v63, 0.0  ;;  %v862_v51 = vpop.permute.xlu1 %861 }
 0x25f   :  { %v885_v7 = vmul.f32 %v837_v43, %v757_v0  ;;  %v759_v10 = vmax.f32 %v714_v1, 0.0  ;;  %v1089_v0 = vmov 1966171168  }
 0x260   :  { %v905_v12 = vadd.f32 %v904_v56, %v884_v5  ;;  %v886_v13 = vmul.f32 %v842_v58, %v758_v9  ;;  %v946_v1 = vunpack.c.l.s4 %v1089_v0  ;;  %v948_v5 = vlaneseq }
 0x261   :  { %v926_v14 = vadd.f32 %v925_v59, %v885_v7  ;;  %v887_v15 = vmul.f32 %v842_v58, %v759_v10  ;;  %v717_v16 = vpop.f32.mrb[24].mxu1 }
 0x262   :  { %v906_v17 = vadd.f32 %v905_v12, %v886_v13  ;;  %v718_v4 = vadd.f32 %v717_v16, %v558_v18  ;;  %v719_v3 = vpop.f32.mrb[25].mxu1  ;;  %v939_v12 = vstv %s1498_s6  ;;  %v947_v13 = vunpack.c.0.s8 %v946_v1 }
 0x263   :  { %v927_v19 = vadd.f32 %v926_v14, %v887_v15  ;;  %v720_v8 = vadd.f32 %v719_v3, %v558_v18  ;;  %v721_v22 = vpop.f32.mrb[26].mxu1  ;;  %vm962_vm1 = vcmp.lt.s32.totalorder %v948_v5, 256 }
 0x264   :  { %v760_v23 = vmax.f32 %v718_v4, 0.0  ;;  %v722_v25 = vadd.f32 %v721_v22, %v563_v55  ;;  %v723_v24 = vpop.f32.mrb[27].mxu1 }
 0x265   :  { %v761_v26 = vmax.f32 %v720_v8, 0.0  ;;  %v724_v21 = vadd.f32 %v723_v24, %v563_v55 }
 0x266   :  { %v888_v27 = vmul.f32 %v847_v2, %v760_v23  ;;  %v762_v28 = vmax.f32 %v722_v25, 0.0 }
 0x267   :  { %v889_v30 = vmul.f32 %v847_v2, %v761_v26  ;;  %v763_v31 = vmax.f32 %v724_v21, 0.0  ;;  %v949_v2 = vshrl.u32 %v948_v5, 7 }
 0x268   :  { %v907_v32 = vadd.f32 %v906_v17, %v888_v27  ;;  %v890_v6 = vmul.f32 %v852_v29, %v762_v28 }
 0x269   :  { %v928_v34 = vadd.f32 %v927_v19, %v889_v30  ;;  %v891_v35 = vmul.f32 %v852_v29, %v763_v31  ;;  %v727_v36 = vpop.f32.mrb[28].mxu1  ;;  %v950_v4 = vsub.s32 %v947_v13, %v949_v2 }
 0x26a   :  { %v908_v38 = vadd.f32 %v907_v32, %v890_v6  ;;  %v728_v39 = vadd.f32 %v727_v36, %v568_v11  ;;  %v729_v18 = vpop.f32.mrb[29].mxu1 }
 0x26b   :  { %v929_v40 = vadd.f32 %v928_v34, %v891_v35  ;;  %v730_v41 = vadd.f32 %v729_v18, %v568_v11  ;;  %v731_v42 = vpop.f32.mrb[30].mxu1 }
 0x26c   :  { %v764_v43 = vmax.f32 %v728_v39, 0.0  ;;  %v732_v37 = vadd.f32 %v731_v42, %v573_v20  ;;  %v733_v44 = vpop.f32.mrb[31].mxu1 }
 0x26d   :  { %v765_v46 = vmax.f32 %v730_v41, 0.0  ;;  %v734_v47 = vadd.f32 %v733_v44, %v573_v20 }
 0x26e   :  { %v892_v48 = vmul.f32 %v857_v45, %v764_v43  ;;  %v766_v50 = vmax.f32 %v732_v37, 0.0 }
 0x26f   :  { %v893_v52 = vmul.f32 %v857_v45, %v765_v46  ;;  %v767_v53 = vmax.f32 %v734_v47, 0.0 }
 0x270   :  { %v909_v54 = vadd.f32 %v908_v38, %v892_v48  ;;  %v894_v55 = vmul.f32 %v862_v51, %v766_v50 }
 0x271   :  { %v930_v56 = vadd.f32 %v929_v40, %v893_v52  ;;  %v895_v33 = vmul.f32 %v862_v51, %v767_v53 }
 0x272   :  { %v910_v57 = vadd.f32 %v909_v54, %v894_v55 }
 0x273   :  { %v931_v58 = vadd.f32 %v930_v56, %v895_v33 }
 0x274   :  { %v911_v59 = vrot.slane %v910_v57, 4 }
 0x275   :  { %v932_v60 = vrot.slane %v931_v58, 4 }
 0x276   :  { %v912_v61 = vadd.f32 %v911_v59, %v910_v57 }
 0x277   :  { %v933_v62 = vadd.f32 %v932_v60, %v931_v58 }
 0x278   :  { %v913_v63 = vrot.slane %v912_v61, 2 }
 0x279   :  { %v934_v49 = vrot.slane %v933_v62, 2 }
 0x27a   :  { %v914_v9 = vadd.f32 %v913_v63, %v912_v61 }
 0x27b   :  { %v935_v7 = vadd.f32 %v934_v49, %v933_v62 }
 0x27c   :  { %v915_v10 = vrot.slane %v914_v9, 1 }
 0x27d   :  { %v936_v11 = vrot.slane %v935_v7, 1 }
 0x27e   :  { %v916_v14 = vadd.f32 %v915_v10, %v914_v9 }
 0x27f   :  { %v937_v15 = vadd.f32 %v936_v11, %v935_v7 }
 0x280   :  { %v940_v16 = vadd.f32 %v939_v12, %v916_v14 }
 0x281   :  { %v941_v17 = vadd.f32 %v939_v12, %v937_v15 }
 0x283   :  { %v944_v3 = vcombine.low %v940_v16, %v941_v17 }
 0x285   :  { %v951_v19 = vrot.slane %v944_v3, %v950_v4 }
 0x287   :  { %v958_v8 = vrot.slane %v951_v19, %v950_v4 }
 0x289   :  { %964 = vst.msk [vmem:[#allocation3] sm:$0x3] %vm962_vm1, %v958_v8 }
 0x28a   :  { %1075 = shalt.err (!%p1072_p4)
}
 0x28b   :  { %s1076_s25 = scalar_lea.hbm %s1499_s7, 32 }
 0x28c   :  { %p1077_p5 = scmp.ne.s32.totalorder %s1499_s7, %s1076_s25  ;;  %p1080_p6 = scmp.lt.u32.totalorder %s1076_s25, %s1499_s7 }
 0x28e   :  { %p1082_p7 = pnand %p1080_p6, %p1077_p5 }
 0x290   :  { %1085 = shalt.err (!%p1082_p7)
}
 0x291   :  { %974 = dma.vmem_to_hbm [thread:$0]  %s972_s23, 32, %s1499_s7, [#allocation4]  }
 0x292   :  { %1086 = dma.done.wait [#allocation4], 32  }
 0x293   :  { %1087 = vsyncadd [#allocation4], 4294967264 }
 0x294   :  { %978 = vsyncpa [#allocation4], 1 }

</bundles_post_ra>
